<compile_context>
chip_gen: v6e
topology: v6e:2x2x1
jax: 0.10.0
libtpu: 0.0.40
codegen_flags: <defaults>
</compile_context>

<pallas_src>
import functools

import jax
import jax.numpy as jnp
from jax.experimental import pallas as pl
from jax.experimental.pallas import tpu as pltpu


def _bce_kernel(o_ref, t_ref, out_ref, acc_ref, *,
                tiles_per_core, tr, rows, need_mask, num_tiles):
    j = pl.program_id(1)

    @pl.when(j == 0)
    def _init():
        acc_ref[...] = jnp.zeros_like(acc_ref)

    o = o_ref[...].astype(jnp.float32)
    t = t_ref[...].astype(jnp.float32)

    def _contrib(o_v, t_v):
        # PyTorch binary_cross_entropy clamps both log terms at -100.
        log_o = jnp.maximum(jnp.log(o_v), -100.0)
        log_1mo = jnp.maximum(jnp.log1p(-o_v), -100.0)
        # == t*log(o) + (1-t)*log(1-o); negation is folded into the wrapper.
        return log_1mo + t_v * (log_o - log_1mo)

    def _accumulate(contrib):
        if tr % 8 == 0 and tr > 8:
            # Layout-free reshape + sublane-group sum into the slim (8, L) acc.
            acc_ref[...] += contrib.reshape(tr // 8, 8, contrib.shape[-1]).sum(axis=0)
        else:
            acc_ref[...] += contrib

    if need_mask:
        c = pl.program_id(0)
        global_tile = c * tiles_per_core + j
        is_ragged = global_tile == (num_tiles - 1)

        @pl.when(global_tile != (num_tiles - 1))
        def _full_tile():
            _accumulate(_contrib(o, t))

        @pl.when(is_ragged)
        def _ragged_tile():
            # The last tile is clipped by Pallas; the unspecified region must
            # not feed log(). Substitute a safe value, zero its contribution.
            row_idx = global_tile * tr + jax.lax.broadcasted_iota(
                jnp.int32, o.shape, 0)
            valid = row_idx < rows
            contrib = _contrib(jnp.where(valid, o, 0.5),
                               jnp.where(valid, t, 0.5))
            _accumulate(jnp.where(valid, contrib, 0.0))
    else:
        _accumulate(_contrib(o, t))

    @pl.when(j == pl.num_programs(1) - 1)
    def _finalize():
        # Per-core partial (un-normalized, un-negated) sum, broadcast over a
        # full (8,128)-aligned output block; the wrapper reads [:, 0, 0].
        out_ref[...] = jnp.broadcast_to(jnp.sum(acc_ref[...]), out_ref.shape)


def _pick_tr(rows, tr_target):
    """Row-tile size: constant block bytes, prefer exact (even-count) divisors."""
    if rows <= tr_target:
        if rows >= 16 and rows % 16 == 0:
            return rows // 2          # two clean tiles -> enables 2-core split
        return rows                   # single full-extent block
    min_clean = max(8, (tr_target // 2 // 8) * 8)
    best_div = None
    t = tr_target
    while t >= min_clean:
        if rows % t == 0:
            if (rows // t) % 2 == 0:
                return t              # clean division AND even tile count
            if best_div is None:
                best_div = t
        t -= 8
    if best_div is not None:
        return best_div
    return tr_target                  # ragged last tile, masked in-kernel


def bce_loss(outputs, targets, *, lanes=1024, target_block_bytes=4 * 1024 * 1024):
    """Mean binary cross entropy over all elements (PyTorch semantics).

    Accepts any float dtype (bf16 inputs halve HBM traffic; the kernel
    upcasts to f32 internally). Inputs must lie in [0, 1].
    """
    assert outputs.shape == targets.shape, (outputs.shape, targets.shape)
    n = 1
    for s in outputs.shape:
        n *= int(s)

    o_flat = outputs.reshape(-1)
    t_flat = targets.reshape(-1)

    # Lane width that divides n so the reshape is free (no pad copy).
    chosen = None
    for cand in dict.fromkeys((int(lanes), 1024, 512, 256, 128)):
        if cand >= 128 and cand % 128 == 0 and n % cand == 0:
            chosen = cand
            break

    if chosen is None:
        # Rare fallback: zero-pad to a multiple of 128. Padding with o=0, t=0
        # contributes exactly 0 to the clamped-BCE sum (0 * -100 = 0).
        chosen = 128
        n_pad = pl.cdiv(n, 128) * 128
        o_flat = jnp.pad(o_flat, (0, n_pad - n))
        t_flat = jnp.pad(t_flat, (0, n_pad - n))
    else:
        n_pad = n

    rows = n_pad // chosen
    o2 = o_flat.reshape(rows, chosen)
    t2 = t_flat.reshape(rows, chosen)

    # Constant ~target_block_bytes of f32 per input block, independent of lane
    # width; prefer exact divisors so the mask compiles out.
    tr_target = max(8, (int(target_block_bytes) // (4 * chosen) // 8) * 8)
    tr = _pick_tr(rows, tr_target)

    num_tiles = pl.cdiv(rows, tr)
    need_mask = (rows % tr) != 0
    # 2-way split (maps to both TCs on v7x via the "parallel" axis); only when
    # the tile count is even so no fabricated out-of-bounds tiles exist.
    num_cores = 2 if (num_tiles >= 2 and num_tiles % 2 == 0) else 1
    tiles_per_core = num_tiles // num_cores

    acc_rows = 8 if (tr % 8 == 0 and tr > 8) else tr

    kernel = functools.partial(
        _bce_kernel, tiles_per_core=tiles_per_core, tr=tr, rows=rows,
        need_mask=need_mask, num_tiles=num_tiles)

    partials = pl.pallas_call(
        kernel,
        out_shape=jax.ShapeDtypeStruct((num_cores, 8, 128), jnp.float32),
        grid_spec=pltpu.PrefetchScalarGridSpec(
            num_scalar_prefetch=0,
            grid=(num_cores, tiles_per_core),
            in_specs=[
                pl.BlockSpec((tr, chosen),
                             lambda c, j: (c * tiles_per_core + j, 0)),
                pl.BlockSpec((tr, chosen),
                             lambda c, j: (c * tiles_per_core + j, 0)),
            ],
            out_specs=pl.BlockSpec((1, 8, 128), lambda c, j: (c, 0, 0)),
            scratch_shapes=[pltpu.VMEM((acc_rows, chosen), jnp.float32)],
        ),
        compiler_params=pltpu.CompilerParams(
            dimension_semantics=("parallel", "arbitrary"),
            # 2 inputs x 2 pipeline buffers x ~4 MiB + small acc + elementwise
            # temporaries; comfortably below v7x's 64 MiB per TC.
            vmem_limit_bytes=40 * 1024 * 1024,
        ),
    )(o2, t2)

    total = jnp.sum(partials[:, 0, 0])
    # Fold the loss negation into the final normalization.
    return total / jnp.float32(-n)


def _bce_ref(outputs, targets):
    b = outputs.shape[0]
    o = outputs.reshape(b, -1).astype(jnp.float32)
    t = targets.reshape(b, -1).astype(jnp.float32)
    return jnp.mean(
        -(t * jnp.maximum(jnp.log(o), -100.0)
          + (1.0 - t) * jnp.maximum(jnp.log1p(-o), -100.0))
    )


if __name__ == "__main__":
    key = jax.random.PRNGKey(0)
    k1, k2, k3, k4, k5, k6, k7, k8 = jax.random.split(key, 8)

    # 1) Primary case: NCHW inputs like the PyTorch module's forward.
    B, C, H, W = 2, 4, 16, 16
    outputs = jax.nn.sigmoid(jax.random.normal(k1, (B, C, H, W), jnp.float32))
    targets = jax.random.uniform(k2, (B, C, H, W), jnp.float32)
    loss = bce_loss(outputs, targets)
    jax.block_until_ready(loss)
    ref = _bce_ref(outputs, targets)
    assert jnp.allclose(loss, ref, atol=1e-5, rtol=1e-5), (loss, ref)

    # 2) Non-divisible element count -> zero-pad fallback path.
    o2 = jax.nn.sigmoid(jax.random.normal(k3, (2, 3, 18, 20), jnp.float32))
    t2 = jax.random.uniform(k4, (2, 3, 18, 20), jnp.float32)
    loss2 = bce_loss(o2, t2)
    jax.block_until_ready(loss2)
    ref2 = _bce_ref(o2, t2)
    assert jnp.allclose(loss2, ref2, atol=1e-5, rtol=1e-5), (loss2, ref2)

    # 3) Clean multi-tile path: 2-way core split + folded (8, L) accumulator.
    o3 = jax.nn.sigmoid(jax.random.normal(k5, (2, 4, 64, 64), jnp.float32))
    t3 = jax.random.uniform(k6, (2, 4, 64, 64), jnp.float32)
    loss3 = bce_loss(o3, t3, target_block_bytes=16 * 1024 * 4)
    jax.block_until_ready(loss3)
    ref3 = _bce_ref(o3, t3)
    assert jnp.allclose(loss3, ref3, atol=1e-5, rtol=1e-5), (loss3, ref3)

    # 4) Ragged last row-tile path (mask gated to the final grid step only).
    o4 = jax.nn.sigmoid(jax.random.normal(k7, (2, 5, 32, 32), jnp.float32))
    t4 = jax.random.uniform(k8, (2, 5, 32, 32), jnp.float32)
    loss4 = bce_loss(o4, t4, target_block_bytes=8 * 1024 * 4)
    jax.block_until_ready(loss4)
    ref4 = _bce_ref(o4, t4)
    assert jnp.allclose(loss4, ref4, atol=1e-5, rtol=1e-5), (loss4, ref4)

    print("KERNEL_OK")
</pallas_src>

<mosaic_0001>
module attributes {stable_mosaic.version = 11 : i64} {
  func.func @_bce_kernel(%arg0: i32, %arg1: i32, %arg2: memref<2x1024xf32, #tpu.memory_space<vmem>>, %arg3: memref<2x1024xf32, #tpu.memory_space<vmem>>, %arg4: memref<1x8x128xf32, #tpu.memory_space<vmem>>, %arg5: memref<2x1024xf32, #tpu.memory_space<vmem>>) attributes {dimension_semantics = [#tpu.dimension_semantics<parallel>, #tpu.dimension_semantics<arbitrary>], iteration_bounds = array<i64: 1, 1>, scalar_prefetch = 0 : i64, scratch_operands = 1 : i64, tpu.core_type = #tpu.core_type<tc>, window_params = [{transform_indices = @transform_0, window_bounds = array<i64: 2, 1024>}, {transform_indices = @transform_1, window_bounds = array<i64: 2, 1024>}, {transform_indices = @transform_2, window_bounds = array<i64: 1, 8, 128>}]} {
    %c0_i32 = arith.constant 0 : i32
    %0 = arith.cmpi eq, %arg1, %c0_i32 : i32
    %1 = arith.extui %0 : i1 to i32
    %c0_i32_0 = arith.constant 0 : i32
    %2 = arith.cmpi ne, %1, %c0_i32_0 : i32
    scf.if %2 {
      %cst_12 = arith.constant 0.000000e+00 : f32
      %22 = vector.broadcast %cst_12 : f32 to vector<2x1024xf32>
      %c0_13 = arith.constant 0 : index
      %c0_14 = arith.constant 0 : index
      %23 = vector.load %arg5[%c0_13, %c0_14] : memref<2x1024xf32, #tpu.memory_space<vmem>>, vector<2x1024xf32>
      tpu.vector_store %arg5[%c0_13, %c0_14], %22 {strides = array<i32>} : memref<2x1024xf32, #tpu.memory_space<vmem>>, vector<2x1024xf32>,
    } else {
    }
    %c0 = arith.constant 0 : index
    %c0_1 = arith.constant 0 : index
    %3 = vector.load %arg2[%c0, %c0_1] : memref<2x1024xf32, #tpu.memory_space<vmem>>, vector<2x1024xf32>
    %c0_2 = arith.constant 0 : index
    %c0_3 = arith.constant 0 : index
    %4 = vector.load %arg3[%c0_2, %c0_3] : memref<2x1024xf32, #tpu.memory_space<vmem>>, vector<2x1024xf32>
    %5 = math.log %3 : vector<2x1024xf32>
    %cst = arith.constant -1.000000e+02 : f32
    %6 = vector.broadcast %cst : f32 to vector<2x1024xf32>
    %7 = arith.maximumf %5, %6 : vector<2x1024xf32>
    %cst_4 = arith.constant 0.000000e+00 : f32
    %8 = vector.broadcast %cst_4 : f32 to vector<2x1024xf32>
    %9 = arith.subf %8, %3 : vector<2x1024xf32>
    %10 = math.log1p %9 : vector<2x1024xf32>
    %cst_5 = arith.constant -1.000000e+02 : f32
    %11 = vector.broadcast %cst_5 : f32 to vector<2x1024xf32>
    %12 = arith.maximumf %10, %11 : vector<2x1024xf32>
    %13 = arith.subf %7, %12 : vector<2x1024xf32>
    %14 = arith.mulf %4, %13 : vector<2x1024xf32>
    %15 = arith.addf %12, %14 : vector<2x1024xf32>
    %c0_6 = arith.constant 0 : index
    %c0_7 = arith.constant 0 : index
    %16 = vector.load %arg5[%c0_6, %c0_7] : memref<2x1024xf32, #tpu.memory_space<vmem>>, vector<2x1024xf32>
    %17 = arith.addf %16, %15 : vector<2x1024xf32>
    %c0_8 = arith.constant 0 : index
    %c0_9 = arith.constant 0 : index
    %18 = vector.load %arg5[%c0_8, %c0_9] : memref<2x1024xf32, #tpu.memory_space<vmem>>, vector<2x1024xf32>
    tpu.vector_store %arg5[%c0_8, %c0_9], %17 {strides = array<i32>} : memref<2x1024xf32, #tpu.memory_space<vmem>>, vector<2x1024xf32>,
    %c0_i32_10 = arith.constant 0 : i32
    %19 = arith.cmpi eq, %arg1, %c0_i32_10 : i32
    %20 = arith.extui %19 : i1 to i32
    %c0_i32_11 = arith.constant 0 : i32
    %21 = arith.cmpi ne, %20, %c0_i32_11 : i32
    scf.if %21 {
      %c0_12 = arith.constant 0 : index
      %c0_13 = arith.constant 0 : index
      %22 = vector.load %arg5[%c0_12, %c0_13] : memref<2x1024xf32, #tpu.memory_space<vmem>>, vector<2x1024xf32>
      %23 = vector.shape_cast %22 : vector<2x1024xf32> to vector<1x2x1024xf32>
      %cst_14 = arith.constant dense<0.000000e+00> : vector<1xf32>
      %24 = vector.multi_reduction <add>, %23, %cst_14 [1, 2] : vector<1x2x1024xf32> to vector<1xf32>
      %25 = vector.shape_cast %24 : vector<1xf32> to vector<1x1x1xf32>
      %26 = vector.extract %25[0, 0, 0] : f32 from vector<1x1x1xf32>
      %27 = vector.broadcast %26 : f32 to vector<1x8x128xf32>
      %c0_15 = arith.constant 0 : index
      %c0_16 = arith.constant 0 : index
      %c0_17 = arith.constant 0 : index
      %28 = vector.load %arg4[%c0_15, %c0_16, %c0_17] : memref<1x8x128xf32, #tpu.memory_space<vmem>>, vector<1x8x128xf32>
      tpu.vector_store %arg4[%c0_15, %c0_16, %c0_17], %27 {strides = array<i32>} : memref<1x8x128xf32, #tpu.memory_space<vmem>>, vector<1x8x128xf32>,
    } else {
    }
    return
  }
  func.func @transform_0(%arg0: i32, %arg1: i32) -> (i32, i32) {
    %c1_i32 = arith.constant 1 : i32
    %0 = arith.muli %arg0, %c1_i32 : i32
    %1 = arith.addi %0, %arg1 : i32
    %c0_i32 = arith.constant 0 : i32
    %c0_i32_0 = arith.constant 0 : i32
    return %1, %c0_i32 : i32, i32
  }
  func.func @transform_1(%arg0: i32, %arg1: i32) -> (i32, i32) {
    %c1_i32 = arith.constant 1 : i32
    %0 = arith.muli %arg0, %c1_i32 : i32
    %1 = arith.addi %0, %arg1 : i32
    %c0_i32 = arith.constant 0 : i32
    %c0_i32_0 = arith.constant 0 : i32
    return %1, %c0_i32 : i32, i32
  }
  func.func @transform_2(%arg0: i32, %arg1: i32) -> (i32, i32, i32) {
    %c0_i32 = arith.constant 0 : i32
    %c0_i32_0 = arith.constant 0 : i32
    %c0_i32_1 = arith.constant 0 : i32
    return %arg0, %c0_i32, %c0_i32_0 : i32, i32, i32
  }
}

</mosaic_0001>

<bundles_post_ra>
// kernel: tpu_custom_call.1
= control target key start
LH: loop header
LB: loop body
LE: loop exit
PB: predicated region body
PF: predicated region fallthrough
CT: control target
= control target key end

     0   :  { %7 = vsyncpa [#allocation4], 0  ;;  %s304_s0 = inlined_call_operand.hbm [shape: f32[2,1024], index: 0, kind: input, shape index: {}]   ;;  %s305_s1 = inlined_call_operand.hbm [shape: f32[2,1024], index: 1, kind: input, shape index: {}]   ;;  %s306_s2 = inlined_call_operand.hbm [shape: f32[1,8,128], index: 2, kind: output, shape index: {}]  }
   0x1   :  { %8 = vsyncpa [#allocation7], 0 }
   0x2   :  { %9 = vsyncpa [#allocation5], 0  ;;  %s268_s9 = smov [#allocation3]   ;;  %s269_s11 = smov [#allocation6]  }
   0x3   :  { %s20_s10 = sshll.u32 %s268_s9, 4  ;;  %s34_s12 = sshll.u32 %s269_s11, 4  ;;  %s21_s10 = int_to_ptr.vmem [resolvable:$true] %s20_s10  ;;  %s35_s12 = int_to_ptr.vmem [resolvable:$true] %s34_s12 }
   0x4   :  { %s210_s13 = scalar_lea.vmem %s21_s10, 256  ;;  %p215_p1 = scmp.lt.s32.totalorder %s21_s10, %s21_s10 }
   0x5   :  { %p211_p0 = scmp.ne.s32.totalorder %s21_s10, %s210_s13  ;;  %p216_p2 = scmp.lt.s32.totalorder %s210_s13, %s210_s13 }
   0x7   :  { %p217_p3 = por %p216_p2, %p215_p1 }
   0x9   :  { %p218_p4 = pnand %p217_p3, %p211_p0 }
   0xb   :  { %221 = shalt.err (!%p218_p4)
}
   0xc   :  { %23 = dma.hbm_to_vmem [thread:$0]  %s304_s0, 256, %s21_s10, [#allocation4]  }
   0xd   :  { %s230_s16 = scalar_lea.vmem %s35_s12, 256  ;;  %p235_p6 = scmp.lt.s32.totalorder %s35_s12, %s35_s12 }
   0xe   :  { %p231_p5 = scmp.ne.s32.totalorder %s35_s12, %s230_s16  ;;  %p236_p7 = scmp.lt.s32.totalorder %s230_s16, %s230_s16 }
  0x10   :  { %p237_p8 = por %p236_p7, %p235_p6 }
  0x12   :  { %p238_p9 = pnand %p237_p8, %p231_p5 }
  0x14   :  { %241 = shalt.err (!%p238_p9)
}
  0x15   :  { %37 = dma.hbm_to_vmem [thread:$0]  %s305_s1, 256, %s35_s12, [#allocation7]  }
  0x16   :  { %262 = dma.done.wait [#allocation4], 256  }
  0x17   :  { %263 = vsyncadd [#allocation4], 4294967040 }
  0x18   :  { %264 = dma.done.wait [#allocation7], 256  }
  0x19   :  { %265 = vsyncadd [#allocation7], 4294967040  ;;  %v52_v0 = vld [vmem:[#allocation3] sm:$0xff]  ;;  %v53_v1 = vld [vmem:[#allocation3 + $0x8] sm:$0xff]  ;;  %v270_v19 = vmov 1983009808   ;;  %v107_v21 = vlaneseq }
  0x1a   :  { %194 = vlog2.f32 %v52_v0  ;;  %v62_v2 = vsub.f32 0.0, %v52_v0  ;;  %v63_v3 = vsub.f32 0.0, %v53_v1  ;;  %v105_v20 = vunpack.c.l.s4 %v270_v19  ;;  %v54_v32 = vld [vmem:[#allocation6] sm:$0xff]  ;;  %v55_v34 = vld [vmem:[#allocation6 + $0x8] sm:$0xff]  ;;  %s271_s0 = smov [#allocation8]  }
  0x1b   :  { %196 = vlog2.f32 %v53_v1  ;;  %v108_v31 = vshrl.u32 %v107_v21, 7  ;;  %vm145_vm2 = vcmask 1041408   ;;  %s178_s1 = sshll.u32 %s271_s0, 4  ;;  %s179_s1 = int_to_ptr.vmem [resolvable:$true] %s178_s1 }
  0x1c   :  { %v64_v4 = vadd.f32 1.0, %v62_v2  ;;  %v73_v5 = vadd.f32 1.0, %v63_v3  ;;  %v67_v6 = vmul.f32 -0.5, %v62_v2  ;;  %v76_v7 = vmul.f32 -0.5, %v63_v3  ;;  %s242_s20 = scalar_lea.vmem %s179_s1, 128  ;;  %p247_p11 = scmp.lt.s32.totalorder %s179_s1, %s179_s1 }
  0x1d   :  { %v70_v10 = vand.u32 2147483647, %v62_v2  ;;  %v79_v13 = vand.u32 2147483647, %v63_v3  ;;  %v106_v30 = vunpack.c.0.s8 %v105_v20  ;;  %p243_p10 = scmp.ne.s32.totalorder %s179_s1, %s242_s20  ;;  %p248_p12 = scmp.lt.s32.totalorder %s242_s20, %s242_s20 }
  0x1e   :  { %198 = vlog2.f32 %v64_v4  ;;  %v68_v8 = vadd.f32 1.0, %v67_v6  ;;  %v77_v11 = vadd.f32 1.0, %v76_v7 }
  0x1f   :  { %200 = vlog2.f32 %v73_v5  ;;  %vm71_vm0 = vcmp.lt.f32.partialorder %v70_v10, 0.0004427343  ;;  %vm80_vm1 = vcmp.lt.f32.partialorder %v79_v13, 0.0004427343  ;;  %v109_v38 = vsub.s32 %v106_v30, %v108_v31  ;;  %p249_p13 = por %p248_p12, %p247_p11 }
  0x20   :  { %v69_v16 = vmul.f32 %v68_v8, %v62_v2  ;;  %v78_v18 = vmul.f32 %v77_v11, %v63_v3 }
  0x21   :  { %p250_p0 = pnand %p249_p13, %p243_p10 }
  0x27   :  { %v195_v9 = vpop.eup %194 }
  0x28   :  { %v197_v12 = vpop.eup %196  ;;  %v57_v14 = vmul.f32 0.6931472, %v195_v9 }
  0x29   :  { %v59_v15 = vmul.f32 0.6931472, %v197_v12 }
  0x2a   :  { %v60_v24 = vmax.f32 %v57_v14, -100.0 }
  0x2b   :  { %v199_v17 = vpop.eup %198  ;;  %v61_v26 = vmax.f32 %v59_v15, -100.0 }
  0x2c   :  { %v201_v22 = vpop.eup %200  ;;  %v66_v23 = vmul.f32 0.6931472, %v199_v17 }
  0x2d   :  { %v75_v25 = vmul.f32 0.6931472, %v201_v22 }
  0x2e   :  { %v72_v27 = vsel %vm71_vm0, %v69_v16, %v66_v23 }
  0x2f   :  { %v81_v28 = vsel %vm80_vm1, %v78_v18, %v75_v25  ;;  %v82_v29 = vmax.f32 %v72_v27, -100.0 }
  0x30   :  { %v83_v33 = vmax.f32 %v81_v28, -100.0 }
  0x31   :  { %v84_v35 = vsub.f32 %v60_v24, %v82_v29 }
  0x32   :  { %v85_v36 = vsub.f32 %v61_v26, %v83_v33 }
  0x33   :  { %v86_v37 = vmul.f32 %v84_v35, %v54_v32 }
  0x34   :  { %v87_v39 = vmul.f32 %v85_v36, %v55_v34 }
  0x35   :  { %v88_v40 = vadd.f32 %v86_v37, %v82_v29 }
  0x36   :  { %v89_v41 = vadd.f32 %v87_v39, %v83_v33 }
  0x37   :  { %v103_v42 = vcombine.high %v88_v40, %v88_v40  ;;  %v110_v43 = vrot.slane %v88_v40, %v109_v38 }
  0x38   :  { %v120_v44 = vcombine.high %v89_v41, %v89_v41  ;;  %v127_v47 = vrot.slane %v89_v41, %v109_v38 }
  0x39   :  { %v117_v45 = vrot.slane %v103_v42, %v109_v38  ;;  %v118_v46 = vcombine.high %v110_v43, %v110_v43  ;;  %v146_v48 = vsel %vm145_vm2, %v110_v43, 0.0 }
  0x3a   :  { %v134_v53 = vrot.slane %v120_v44, %v109_v38  ;;  %v135_v54 = vcombine.high %v127_v47, %v127_v47  ;;  %v153_v57 = vsel %vm145_vm2, %v127_v47, 0.0 }
  0x3b   :  { %v119_v49 = vcombine.high %v117_v45, %v117_v45  ;;  %v147_v50 = vsel %vm145_vm2, %v118_v46, 0.0  ;;  %v149_v51 = vsel %vm145_vm2, %v117_v45, 0.0 }
  0x3c   :  { %v148_v52 = vadd.f32 %v147_v50, %v146_v48  ;;  %v136_v59 = vcombine.high %v134_v53, %v134_v53  ;;  %v155_v60 = vsel %vm145_vm2, %v135_v54, 0.0  ;;  %v157_v62 = vsel %vm145_vm2, %v134_v53, 0.0 }
  0x3d   :  { %v151_v55 = vsel %vm145_vm2, %v119_v49, 0.0 }
  0x3e   :  { %v150_v56 = vadd.f32 %v149_v51, %v148_v52  ;;  %v159_v0 = vsel %vm145_vm2, %v136_v59, 0.0 }
  0x40   :  { %v152_v58 = vadd.f32 %v151_v55, %v150_v56 }
  0x42   :  { %v154_v61 = vadd.f32 %v153_v57, %v152_v58 }
  0x44   :  { %v156_v63 = vadd.f32 %v155_v60, %v154_v61 }
  0x46   :  { %v158_v1 = vadd.f32 %v157_v62, %v156_v63 }
  0x48   :  { %v160_v2 = vadd.f32 %v159_v0, %v158_v1 }
  0x4a   :  { %161 = vadd.xlane.f32.xlu0 %v160_v2 }
  0xd3   :  { %v162_v3 = vpop.xlane.xlu0 %161 }
  0xd4   :  { %v163_v4 = vrot.slane %v162_v3, 4 }
  0xd6   :  { %v164_v5 = vadd.f32 %v163_v4, %v162_v3 }
  0xd8   :  { %v165_v6 = vrot.slane %v164_v5, 2 }
  0xda   :  { %v166_v7 = vadd.f32 %v165_v6, %v164_v5 }
  0xdc   :  { %v167_v8 = vrot.slane %v166_v7, 1 }
  0xde   :  { %v168_v9 = vadd.f32 %v167_v8, %v166_v7 }
  0xe0   :  { %188 = vpush %v168_v9 }
 0x111   :  { %s189_s19 = spop %188 }
 0x112   :  { %v170_v10 = vstv %s189_s19 }
 0x113   :  { %171 = vst [vmem:[#allocation8] sm:$0xff] %v170_v10 }
 0x114   :  { %253 = shalt.err (!%p250_p0)
}
 0x115   :  { %181 = dma.vmem_to_hbm [thread:$0]  %s179_s1, 128, %s306_s2, [#allocation5]  }
 0x116   :  { %266 = dma.done.wait [#allocation5], 128  }
 0x117   :  { %267 = vsyncadd [#allocation5], 4294967168 }
 0x118   :  { %185 = vsyncpa [#allocation4], 1 }
 0x119   :  { %186 = vsyncpa [#allocation7], 1 }
 0x11a   :  { %187 = vsyncpa [#allocation5], 1 }

</bundles_post_ra>
